<compile_context>
chip_gen: v7x
topology: tpu7x:2x2x1
jax: 0.10.0
libtpu: 0.0.40
codegen_flags: <defaults>
</compile_context>

<pallas_src>
import jax
import jax.numpy as jnp
from jax.experimental import pallas as pl
from jax.experimental.pallas import tpu as pltpu


def _round_up(v, m):
    return -(-v // m) * m


def _conv_bn_silu_kernel(a_ref, b_ref, scale_ref, shift_ref, o_ref, acc_ref):
    # Grid: (M tiles, N tiles, K tiles); K is the reduction axis.
    @pl.when(pl.program_id(2) == 0)
    def _():
        acc_ref[...] = jnp.zeros_like(acc_ref)

    acc_ref[...] += jnp.dot(
        a_ref[...], b_ref[...], preferred_element_type=jnp.float32
    )

    @pl.when(pl.program_id(2) == pl.num_programs(2) - 1)
    def _():
        # Folded BatchNorm affine (per output channel) + SiLU epilogue.
        y = acc_ref[...] * scale_ref[...] + shift_ref[...]
        o_ref[...] = (y * jax.nn.sigmoid(y)).astype(o_ref.dtype)


def _fused_matmul_bn_silu(a, b, scale, shift):
    """(M, K) @ (K, Cout), then per-column scale/shift + SiLU, on the MXU."""
    m, k = a.shape
    _, n = b.shape

    tm = min(256, _round_up(m, 8))          # sublane-aligned M tile
    tn = 128                                # lane-dense output tile
    k_pad = _round_up(k, 128)
    tk = 512 if k_pad % 512 == 0 else (256 if k_pad % 256 == 0 else 128)
    tk = min(tk, k_pad)

    m_pad = _round_up(m, tm)
    n_pad = _round_up(n, tn)

    a_p = jnp.pad(a, ((0, m_pad - m), (0, k_pad - k)))
    b_p = jnp.pad(b, ((0, k_pad - k), (0, n_pad - n)))
    scale_p = jnp.pad(
        scale.reshape(1, -1), ((0, 0), (0, n_pad - n)), constant_values=1.0
    )
    shift_p = jnp.pad(shift.reshape(1, -1), ((0, 0), (0, n_pad - n)))

    grid = (m_pad // tm, n_pad // tn, k_pad // tk)

    out = pl.pallas_call(
        _conv_bn_silu_kernel,
        out_shape=jax.ShapeDtypeStruct((m_pad, n_pad), a.dtype),
        grid_spec=pltpu.PrefetchScalarGridSpec(
            num_scalar_prefetch=0,
            grid=grid,
            in_specs=[
                pl.BlockSpec((tm, tk), lambda i, j, kk: (i, kk)),
                pl.BlockSpec((tk, tn), lambda i, j, kk: (kk, j)),
                pl.BlockSpec((1, tn), lambda i, j, kk: (0, j)),
                pl.BlockSpec((1, tn), lambda i, j, kk: (0, j)),
            ],
            out_specs=pl.BlockSpec((tm, tn), lambda i, j, kk: (i, j)),
            scratch_shapes=[pltpu.VMEM((tm, tn), jnp.float32)],
        ),
        compiler_params=pltpu.CompilerParams(
            dimension_semantics=("parallel", "parallel", "arbitrary")
        ),
    )(a_p, b_p, scale_p, shift_p)
    return out[:m, :n]


@jax.jit
def downsample_x8(x, weight, gamma, beta, running_mean, running_var, eps=1e-5):
    """Forward of Downsample_x8: Conv2d(k=8,s=8,p=3,bias=False) -> BN -> SiLU.

    x:      (N, C_in, H, W)       float32
    weight: (C_out, C_in, 8, 8)   float32
    gamma, beta, running_mean, running_var: (C_out,) float32
    returns (N, C_out, H_out, W_out)
    """
    n, c_in, h, w = x.shape
    c_out = weight.shape[0]
    ks, stride, pad = 8, 8, 3
    h_out = (h + 2 * pad - ks) // stride + 1
    w_out = (w + 2 * pad - ks) // stride + 1

    # Zero-pad and crop to the region covered by the conv windows.
    x_p = jnp.pad(x, ((0, 0), (0, 0), (pad, pad), (pad, pad)))
    x_p = x_p[:, :, : h_out * stride, : w_out * stride]

    # im2col: (N, C_in, Ho, 8, Wo, 8) -> (N, Ho, Wo, C_in, 8, 8) -> (M, K)
    patches = x_p.reshape(n, c_in, h_out, ks, w_out, ks)
    patches = patches.transpose(0, 2, 4, 1, 3, 5)
    a = patches.reshape(n * h_out * w_out, c_in * ks * ks)

    # Weight -> (K, C_out) so the output's last dim is the channel dim.
    b = weight.reshape(c_out, c_in * ks * ks).T

    # Fold inference BatchNorm into a per-channel affine.
    scale = gamma / jnp.sqrt(running_var + eps)
    shift = beta - running_mean * scale

    out2d = _fused_matmul_bn_silu(a, b, scale, shift)           # (M, C_out)
    out = out2d.reshape(n, h_out, w_out, c_out).transpose(0, 3, 1, 2)
    return out


def downsample_x8_reference(x, weight, gamma, beta, running_mean, running_var,
                            eps=1e-5):
    """Pure-JAX reference matching the PyTorch forward (inference BN)."""
    y = jax.lax.conv_general_dilated(
        x, weight, window_strides=(8, 8), padding=((3, 3), (3, 3)),
        dimension_numbers=("NCHW", "OIHW", "NCHW"),
    )
    scale = gamma / jnp.sqrt(running_var + eps)
    shift = beta - running_mean * scale
    y = y * scale[None, :, None, None] + shift[None, :, None, None]
    return y * jax.nn.sigmoid(y)


if __name__ == "__main__":
    # Small shapes consistent with the module: batch=2, in_channels=4,
    # out_channels=8, spatial 16x16  ->  output (2, 8, 2, 2).
    n, c_in, c_out, h, w = 2, 4, 8, 16, 16

    key = jax.random.PRNGKey(0)
    kx, kw, kg, kb, km, kv = jax.random.split(key, 6)

    x = jax.random.normal(kx, (n, c_in, h, w), dtype=jnp.float32)
    weight = 0.05 * jax.random.normal(kw, (c_out, c_in, 8, 8), dtype=jnp.float32)
    gamma = jax.random.uniform(kg, (c_out,), minval=0.5, maxval=1.5,
                               dtype=jnp.float32)
    beta = 0.1 * jax.random.normal(kb, (c_out,), dtype=jnp.float32)
    running_mean = 0.1 * jax.random.normal(km, (c_out,), dtype=jnp.float32)
    running_var = jax.random.uniform(kv, (c_out,), minval=0.5, maxval=1.5,
                                     dtype=jnp.float32)

    out = downsample_x8(x, weight, gamma, beta, running_mean, running_var)
    out = jax.block_until_ready(out)

    ref = downsample_x8_reference(x, weight, gamma, beta, running_mean,
                                  running_var)

    h_out = (h + 6 - 8) // 8 + 1
    w_out = (w + 6 - 8) // 8 + 1
    assert out.shape == (n, c_out, h_out, w_out), out.shape
    assert jnp.allclose(out, ref, atol=1e-4, rtol=1e-4), float(
        jnp.max(jnp.abs(out - ref))
    )

    print("KERNEL_OK")
</pallas_src>

<mosaic_0001>
module attributes {stable_mosaic.version = 11 : i64} {
  func.func @_conv_bn_silu_kernel(%arg0: i32, %arg1: i32, %arg2: i32, %arg3: memref<8x256xf32, #tpu.memory_space<vmem>>, %arg4: memref<256x128xf32, #tpu.memory_space<vmem>>, %arg5: memref<1x128xf32, #tpu.memory_space<vmem>>, %arg6: memref<1x128xf32, #tpu.memory_space<vmem>>, %arg7: memref<8x128xf32, #tpu.memory_space<vmem>>, %arg8: memref<8x128xf32, #tpu.memory_space<vmem>>) attributes {dimension_semantics = [#tpu.dimension_semantics<parallel>, #tpu.dimension_semantics<parallel>, #tpu.dimension_semantics<arbitrary>], iteration_bounds = array<i64: 1, 1, 1>, scalar_prefetch = 0 : i64, scratch_operands = 1 : i64, tpu.core_type = #tpu.core_type<tc>, window_params = [{transform_indices = @transform_0, window_bounds = array<i64: 8, 256>}, {transform_indices = @transform_1, window_bounds = array<i64: 256, 128>}, {transform_indices = @transform_2, window_bounds = array<i64: 1, 128>}, {transform_indices = @transform_3, window_bounds = array<i64: 1, 128>}, {transform_indices = @transform_4, window_bounds = array<i64: 8, 128>}]} {
    %c0_i32 = arith.constant 0 : i32
    %0 = arith.cmpi eq, %arg2, %c0_i32 : i32
    %1 = arith.extui %0 : i1 to i32
    %c0_i32_0 = arith.constant 0 : i32
    %2 = arith.cmpi ne, %1, %c0_i32_0 : i32
    scf.if %2 {
      %cst_10 = arith.constant 0.000000e+00 : f32
      %12 = vector.broadcast %cst_10 : f32 to vector<8x128xf32>
      %c0_11 = arith.constant 0 : index
      %c0_12 = arith.constant 0 : index
      %13 = vector.load %arg8[%c0_11, %c0_12] : memref<8x128xf32, #tpu.memory_space<vmem>>, vector<8x128xf32>
      tpu.vector_store %arg8[%c0_11, %c0_12], %12 {strides = array<i32>} : memref<8x128xf32, #tpu.memory_space<vmem>>, vector<8x128xf32>,
    } else {
    }
    %c0 = arith.constant 0 : index
    %c0_1 = arith.constant 0 : index
    %3 = vector.load %arg8[%c0, %c0_1] : memref<8x128xf32, #tpu.memory_space<vmem>>, vector<8x128xf32>
    %c0_2 = arith.constant 0 : index
    %c0_3 = arith.constant 0 : index
    %4 = vector.load %arg3[%c0_2, %c0_3] : memref<8x256xf32, #tpu.memory_space<vmem>>, vector<8x256xf32>
    %c0_4 = arith.constant 0 : index
    %c0_5 = arith.constant 0 : index
    %5 = vector.load %arg4[%c0_4, %c0_5] : memref<256x128xf32, #tpu.memory_space<vmem>>, vector<256x128xf32>
    %cst = arith.constant dense<0.000000e+00> : vector<8x128xf32>
    %6 = tpu.matmul %4, %5, %cst {dimension_numbers = #tpu.dot_dimension_numbers<[1], [0], [0], [1], [0, 0, 1, 1], [], []>} : vector<8x256xf32>, vector<256x128xf32>, vector<8x128xf32> -> vector<8x128xf32>
    %7 = arith.addf %3, %6 : vector<8x128xf32>
    %c0_6 = arith.constant 0 : index
    %c0_7 = arith.constant 0 : index
    %8 = vector.load %arg8[%c0_6, %c0_7] : memref<8x128xf32, #tpu.memory_space<vmem>>, vector<8x128xf32>
    tpu.vector_store %arg8[%c0_6, %c0_7], %7 {strides = array<i32>} : memref<8x128xf32, #tpu.memory_space<vmem>>, vector<8x128xf32>,
    %c0_i32_8 = arith.constant 0 : i32
    %9 = arith.cmpi eq, %arg2, %c0_i32_8 : i32
    %10 = arith.extui %9 : i1 to i32
    %c0_i32_9 = arith.constant 0 : i32
    %11 = arith.cmpi ne, %10, %c0_i32_9 : i32
    scf.if %11 {
      %c0_10 = arith.constant 0 : index
      %c0_11 = arith.constant 0 : index
      %12 = vector.load %arg8[%c0_10, %c0_11] : memref<8x128xf32, #tpu.memory_space<vmem>>, vector<8x128xf32>
      %c0_12 = arith.constant 0 : index
      %c0_13 = arith.constant 0 : index
      %13 = vector.load %arg5[%c0_12, %c0_13] : memref<1x128xf32, #tpu.memory_space<vmem>>, vector<1x128xf32>
      %14 = vector.broadcast %13 : vector<1x128xf32> to vector<8x128xf32>
      %15 = arith.mulf %12, %14 : vector<8x128xf32>
      %c0_14 = arith.constant 0 : index
      %c0_15 = arith.constant 0 : index
      %16 = vector.load %arg6[%c0_14, %c0_15] : memref<1x128xf32, #tpu.memory_space<vmem>>, vector<1x128xf32>
      %17 = vector.broadcast %16 : vector<1x128xf32> to vector<8x128xf32>
      %18 = arith.addf %15, %17 : vector<8x128xf32>
      %19 = arith.negf %18 : vector<8x128xf32>
      %20 = math.exp %19 : vector<8x128xf32>
      %cst_16 = arith.constant 1.000000e+00 : f32
      %21 = vector.broadcast %cst_16 : f32 to vector<8x128xf32>
      %22 = arith.addf %21, %20 : vector<8x128xf32>
      %23 = arith.divf %21, %22 : vector<8x128xf32>
      %24 = arith.mulf %18, %23 : vector<8x128xf32>
      %c0_17 = arith.constant 0 : index
      %c0_18 = arith.constant 0 : index
      %25 = vector.load %arg7[%c0_17, %c0_18] : memref<8x128xf32, #tpu.memory_space<vmem>>, vector<8x128xf32>
      tpu.vector_store %arg7[%c0_17, %c0_18], %24 {strides = array<i32>} : memref<8x128xf32, #tpu.memory_space<vmem>>, vector<8x128xf32>,
    } else {
    }
    return
  }
  func.func @transform_0(%arg0: i32, %arg1: i32, %arg2: i32) -> (i32, i32) {
    %c0_i32 = arith.constant 0 : i32
    return %arg0, %arg2 : i32, i32
  }
  func.func @transform_1(%arg0: i32, %arg1: i32, %arg2: i32) -> (i32, i32) {
    %c0_i32 = arith.constant 0 : i32
    return %arg2, %arg1 : i32, i32
  }
  func.func @transform_2(%arg0: i32, %arg1: i32, %arg2: i32) -> (i32, i32) {
    %c0_i32 = arith.constant 0 : i32
    %c0_i32_0 = arith.constant 0 : i32
    return %c0_i32, %arg1 : i32, i32
  }
  func.func @transform_3(%arg0: i32, %arg1: i32, %arg2: i32) -> (i32, i32) {
    %c0_i32 = arith.constant 0 : i32
    %c0_i32_0 = arith.constant 0 : i32
    return %c0_i32, %arg1 : i32, i32
  }
  func.func @transform_4(%arg0: i32, %arg1: i32, %arg2: i32) -> (i32, i32) {
    %c0_i32 = arith.constant 0 : i32
    return %arg0, %arg1 : i32, i32
  }
}

</mosaic_0001>

<bundles_post_ra>
// kernel: downsample_x8.1
= control target key start
LH: loop header
LB: loop body
LE: loop exit
PB: predicated region body
PF: predicated region fallthrough
CT: control target
= control target key end

     0   :  { %s417_s0 = inlined_call_operand.vmem [shape: f32[8,256], index: 0, kind: input, shape index: {}]   ;;  %s418_s1 = inlined_call_operand.vmem [shape: f32[256,128], index: 1, kind: input, shape index: {}]   ;;  %s419_s2 = inlined_call_operand.vmem [shape: f32[1,128], index: 2, kind: input, shape index: {}]   ;;  %s420_s3 = inlined_call_operand.vmem [shape: f32[1,128], index: 3, kind: input, shape index: {}]   ;;  %s421_s4 = inlined_call_operand.hbm [shape: f32[8,128], index: 4, kind: output, shape index: {}]  }
   0x1   :  { %v42_v0 = vld [vmem:[%s418_s1 + $0x80] sm:$0xff]  ;;  %v43_v1 = vld [vmem:[%s418_s1 + $0x88] sm:$0xff]  ;;  %v44_v5 = vld [vmem:[%s418_s1 + $0x90] sm:$0xff] }
   0x2   :  { %v26_v2 = vld [vmem:[%s418_s1] sm:$0xff]  ;;  %v210_v3 = vpack.c.bf16 %v43_v1, %v42_v0  ;;  %v27_v4 = vld [vmem:[%s418_s1 + $0x8] sm:$0xff]  ;;  %v45_v6 = vld [vmem:[%s418_s1 + $0x98] sm:$0xff] }
   0x3   :  { %v212_v7 = vpack.c.bf16 %v27_v4, %v26_v2  ;;  %v214_v8 = vpack.c.bf16 %v45_v6, %v44_v5  ;;  %v28_v9 = vld [vmem:[%s418_s1 + $0x10] sm:$0xff]  ;;  %v29_v10 = vld [vmem:[%s418_s1 + $0x18] sm:$0xff]  ;;  %v46_v11 = vld [vmem:[%s418_s1 + $0xa0] sm:$0xff] }
   0x4   :  { %211 = vmatprep.subr.bf16.mxu0 %v210_v3  ;;  %v47_v12 = vld [vmem:[%s418_s1 + $0xa8] sm:$0xff]  ;;  %v216_v13 = vpack.c.bf16 %v29_v10, %v28_v9  ;;  %v30_v15 = vld [vmem:[%s418_s1 + $0x20] sm:$0xff]  ;;  %v48_v17 = vld [vmem:[%s418_s1 + $0xb0] sm:$0xff] }
   0x5   :  { %213 = vmatpush3.bf16.msra.mxu0 %v212_v7  ;;  %v218_v14 = vpack.c.bf16 %v47_v12, %v46_v11  ;;  %v31_v16 = vld [vmem:[%s418_s1 + $0x28] sm:$0xff]  ;;  %v49_v18 = vld [vmem:[%s418_s1 + $0xb8] sm:$0xff]  ;;  %v32_v21 = vld [vmem:[%s418_s1 + $0x30] sm:$0xff] }
   0x6   :  { %215 = vmatprep.subr.bf16.mxu0 %v214_v8  ;;  %v220_v19 = vpack.c.bf16 %v31_v16, %v30_v15  ;;  %v222_v20 = vpack.c.bf16 %v49_v18, %v48_v17  ;;  %v33_v22 = vld [vmem:[%s418_s1 + $0x38] sm:$0xff]  ;;  %v50_v23 = vld [vmem:[%s418_s1 + $0xc0] sm:$0xff]  ;;  %v51_v24 = vld [vmem:[%s418_s1 + $0xc8] sm:$0xff] }
   0x7   :  { %v25_v25 = vld [vmem:[%s417_s0 + $0x8] sm:$0xff] }
   0x8   :  { %122 = vmatprep.mubr.f32.mxu0 %v25_v25 }
   0x9   :  { %217 = vmatpush3.bf16.msra.mxu0 %v216_v13 }
   0xa   :  { %219 = vmatprep.subr.bf16.mxu0 %v218_v14 }
   0xb   :  { %9 = vsyncpa [#allocation4], 0  ;;  %v224_v26 = vpack.c.bf16 %v33_v22, %v32_v21  ;;  %v226_v27 = vpack.c.bf16 %v51_v24, %v50_v23  ;;  %v34_v28 = vld [vmem:[%s418_s1 + $0x40] sm:$0xff]  ;;  %v35_v29 = vld [vmem:[%s418_s1 + $0x48] sm:$0xff] }
   0xc   :  { %v52_v30 = vld [vmem:[%s418_s1 + $0xd0] sm:$0xff]  ;;  %v53_v31 = vld [vmem:[%s418_s1 + $0xd8] sm:$0xff]  ;;  %v228_v32 = vpack.c.bf16 %v35_v29, %v34_v28  ;;  %v54_v36 = vld [vmem:[%s418_s1 + $0xe0] sm:$0xff] }
   0xd   :  { %221 = vmatpush3.bf16.msra.mxu0 %v220_v19  ;;  %v230_v33 = vpack.c.bf16 %v53_v31, %v52_v30  ;;  %v36_v34 = vld [vmem:[%s418_s1 + $0x50] sm:$0xff]  ;;  %v37_v35 = vld [vmem:[%s418_s1 + $0x58] sm:$0xff]  ;;  %v55_v37 = vld [vmem:[%s418_s1 + $0xe8] sm:$0xff] }
   0xe   :  { %223 = vmatprep.subr.bf16.mxu0 %v222_v20  ;;  %v232_v38 = vpack.c.bf16 %v37_v35, %v36_v34  ;;  %v234_v39 = vpack.c.bf16 %v55_v37, %v54_v36  ;;  %v38_v40 = vld [vmem:[%s418_s1 + $0x60] sm:$0xff]  ;;  %v39_v41 = vld [vmem:[%s418_s1 + $0x68] sm:$0xff]  ;;  %v56_v42 = vld [vmem:[%s418_s1 + $0xf0] sm:$0xff] }
   0xf   :  { %v57_v43 = vld [vmem:[%s418_s1 + $0xf8] sm:$0xff]  ;;  %v236_v44 = vpack.c.bf16 %v39_v41, %v38_v40  ;;  %v40_v46 = vld [vmem:[%s418_s1 + $0x70] sm:$0xff]  ;;  %v24_v49 = vld [vmem:[%s417_s0] sm:$0xff]  ;;  %s271_s0 = smov [#allocation3]  }
  0x10   :  { %v238_v45 = vpack.c.bf16 %v57_v43, %v56_v42  ;;  %v41_v47 = vld [vmem:[%s418_s1 + $0x78] sm:$0xff]  ;;  %v172_v52 = vld [vmem:[%s419_s2] ss:$0 sm:$0xff]  ;;  %s164_s1 = sshll.u32 %s271_s0, 4  ;;  %s165_s1 = int_to_ptr.vmem [resolvable:$true] %s164_s1 }
  0x11   :  { %225 = vmatpush3.bf16.msra.mxu0 %v224_v26  ;;  %v240_v48 = vpack.c.bf16 %v41_v47, %v40_v46  ;;  %v173_v54 = vld [vmem:[%s420_s3] ss:$0 sm:$0xff]  ;;  %s247_s9 = scalar_lea.vmem %s165_s1, 128  ;;  %p252_p1 = scmp.lt.s32.totalorder %s165_s1, %s165_s1 }
  0x12   :  { %227 = vmatprep.subr.bf16.mxu0 %v226_v27  ;;  %p248_p0 = scmp.ne.s32.totalorder %s165_s1, %s247_s9  ;;  %p253_p2 = scmp.lt.s32.totalorder %s247_s9, %s247_s9 }
  0x14   :  { %p254_p3 = por %p253_p2, %p252_p1 }
  0x15   :  { %229 = vmatpush3.bf16.msra.mxu0 %v228_v32 }
  0x16   :  { %231 = vmatprep.subr.bf16.mxu0 %v230_v33  ;;  %p255_p4 = pnand %p254_p3, %p248_p0 }
  0x19   :  { %233 = vmatpush3.bf16.msra.mxu0 %v232_v38 }
  0x1a   :  { %235 = vmatprep.subr.bf16.mxu0 %v234_v39 }
  0x1d   :  { %237 = vmatpush3.bf16.msra.mxu0 %v236_v44 }
  0x1e   :  { %239 = vmatprep.subr.bf16.mxu0 %v238_v45 }
  0x21   :  { %241 = vmatpush3.bf16.msra.mxu0 %v240_v48 }
  0x24   :  { %123 = vmatmul.mubr.f32.vlgmr.msra.gmra.mrb[0].mxu0 %v24_v49 }
  0xf7   :  { %v207_v50 = vpop.f32.mrb[0].mxu0 }
  0xf8   :  { %v208_v51 = vpop.f32.mrb[1].mxu0 }
  0xf9   :  { %v209_v53 = vadd.f32 %v208_v51, %v207_v50 }
  0xfb   :  { %v141_v55 = vmul.f32 %v209_v53, %v172_v52 }
  0xfd   :  { %v149_v56 = vadd.f32 %v173_v54, %v141_v55 }
  0xff   :  { %v174_v57 = vmul.f32 -1.442695, %v149_v56 }
 0x101   :  { %243 = vpow2.f32 %v174_v57 }
 0x10b   :  { %v244_v58 = vpop.eup %243 }
 0x10c   :  { %v153_v59 = vadd.f32 1.0, %v244_v58 }
 0x10e   :  { %245 = vrcp.f32 %v153_v59 }
 0x118   :  { %v246_v60 = vpop.eup %245 }
 0x119   :  { %v156_v61 = vmul.f32 %v246_v60, %v149_v56 }
 0x11b   :  { %157 = vst [vmem:[#allocation3] sm:$0xff] %v156_v61 }
 0x11c   :  { %258 = shalt.err (!%p255_p4)
}
 0x11d   :  { %s259_s10 = scalar_lea.hbm %s421_s4, 128 }
 0x11e   :  { %p260_p5 = scmp.ne.s32.totalorder %s421_s4, %s259_s10  ;;  %p263_p6 = scmp.lt.u32.totalorder %s259_s10, %s421_s4 }
 0x120   :  { %p265_p7 = pnand %p263_p6, %p260_p5 }
 0x122   :  { %268 = shalt.err (!%p265_p7)
}
 0x123   :  { %167 = dma.vmem_to_hbm [thread:$0]  %s165_s1, 128, %s421_s4, [#allocation4]  }
 0x124   :  { %269 = dma.done.wait [#allocation4], 128  }
 0x125   :  { %270 = vsyncadd [#allocation4], 4294967168 }
 0x126   :  { %171 = vsyncpa [#allocation4], 1 }

</bundles_post_ra>
